<compile_context>
chip_gen: v7x
topology: tpu7x:2x2x1
jax: 0.10.0
libtpu: 0.0.40
codegen_flags: <defaults>
</compile_context>

<pallas_src>
import math

import jax
import jax.numpy as jnp
from jax.experimental import pallas as pl
from jax.experimental.pallas import tpu as pltpu

_LANES = 128


def _log_stable_kernel(eps_ref, x_ref, o_ref):
    # Memory-bound hot path. Upcast sub-32-bit inputs to f32 (free slack in an
    # HBM-bound kernel); keep eps in f32 so tiny eps values don't underflow.
    compute_dtype = jnp.promote_types(x_ref.dtype, jnp.float32)
    x = x_ref[...].astype(compute_dtype)
    eps = eps_ref[0].astype(compute_dtype)
    o_ref[...] = jnp.log(x + eps).astype(o_ref.dtype)


def _round_up(a: int, b: int) -> int:
    return -(-a // b) * b


def _chip_config():
    """Generation-aware (block_bytes, vmem_limit_bytes | None, force_two_steps)."""
    kind = ""
    try:
        kind = jax.devices()[0].device_kind.lower()
    except Exception:  # pragma: no cover - defensive; fall back to conservative
        pass
    if "v7" in kind:
        # 2 TCs/chip, ~3.2 TB/s per TC, 64 MiB physical VMEM per TC.
        # 6 MiB blocks -> ~24 MiB double-buffered in+out; raise scoped VMEM.
        return 6 * 1024 * 1024, 48 << 20, True
    if "v6" in kind:
        # 4 MiB blocks -> 16 MiB footprint, fits the 32 MiB scoped default.
        return 4 * 1024 * 1024, None, False
    # v5e (16 MiB scoped default) and anything unknown: conservative 2 MiB.
    return 2 * 1024 * 1024, None, False


def _run_lane_dense(x2d, eps_arr, block_bytes, vmem_limit, force_split):
    """Tiled elementwise kernel over a lane-dense [rows, 128] slab."""
    rows, lanes = x2d.shape
    dtype = x2d.dtype
    itemsize = jnp.dtype(dtype).itemsize
    # Dtype-aware sublane tile: f32 -> 8, bf16/f16 -> 16, int8/fp8 -> 32.
    sublane = {4: 8, 2: 16, 1: 32}.get(itemsize, 8)

    if rows <= sublane:
        rows_per_block = rows  # full row extent (allowed even if < sublane)
    else:
        target = max(
            sublane,
            (block_bytes // (lanes * itemsize)) // sublane * sublane,
        )
        rows_per_block = min(target, rows)
        if force_split:
            # >= 2 grid steps so the single "parallel" axis can be sharded
            # across the 2 TensorCores (v7x only).
            half_up = _round_up(pl.cdiv(rows, 2), sublane)
            rows_per_block = min(rows_per_block, half_up)
    grid_rows = pl.cdiv(rows, rows_per_block)  # partial last block is masked

    params = dict(dimension_semantics=("parallel",))
    if vmem_limit is not None:
        params["vmem_limit_bytes"] = vmem_limit

    return pl.pallas_call(
        _log_stable_kernel,
        out_shape=jax.ShapeDtypeStruct((rows, lanes), dtype),
        grid=(grid_rows,),
        in_specs=[
            pl.BlockSpec(memory_space=pltpu.MemorySpace.SMEM),        # eps scalar
            pl.BlockSpec((rows_per_block, lanes), lambda i: (i, 0)),  # x tile
        ],
        out_specs=pl.BlockSpec((rows_per_block, lanes), lambda i: (i, 0)),
        compiler_params=pltpu.CompilerParams(**params),
    )(eps_arr, x2d)


def _run_tail(tail_flat, eps_arr):
    """Trivial single-block kernel for a < 128-element tail."""
    t = tail_flat.shape[0]
    t2d = tail_flat.reshape(1, t)
    out = pl.pallas_call(
        _log_stable_kernel,
        out_shape=jax.ShapeDtypeStruct((1, t), tail_flat.dtype),
        grid=(1,),
        in_specs=[
            pl.BlockSpec(memory_space=pltpu.MemorySpace.SMEM),
            pl.BlockSpec((1, t), lambda i: (0, 0)),  # full-extent block (< 128 lanes OK)
        ],
        out_specs=pl.BlockSpec((1, t), lambda i: (0, 0)),
    )(eps_arr, t2d)
    return out.reshape(t)


def log_stable(x: jax.Array, eps: float = 1e-8) -> jax.Array:
    orig_shape = x.shape
    n = math.prod(orig_shape) if orig_shape else 1
    if n == 0:
        return x  # empty input: nothing to compute

    eps_arr = jnp.asarray([eps], dtype=jnp.float32)
    block_bytes, vmem_limit, force_split = _chip_config()

    if n % _LANES == 0:
        # Common case: copy-free lane-dense [rows, 128] view of the whole array.
        x2d = x.reshape(n // _LANES, _LANES)
        out2d = _run_lane_dense(x2d, eps_arr, block_bytes, vmem_limit, force_split)
        return out2d.reshape(orig_shape)

    # n % 128 != 0: run the lane-dense bulk through the tiled kernel and the
    # < 128-element remainder through a trivial single-block kernel, instead of
    # processing the whole array with masked narrow-lane stores.
    flat = x.reshape(-1)
    bulk = (n // _LANES) * _LANES
    parts = []
    if bulk:
        bulk2d = flat[:bulk].reshape(bulk // _LANES, _LANES)
        bulk_out = _run_lane_dense(bulk2d, eps_arr, block_bytes, vmem_limit, force_split)
        parts.append(bulk_out.reshape(bulk))
    parts.append(_run_tail(flat[bulk:], eps_arr))
    return jnp.concatenate(parts).reshape(orig_shape)


if __name__ == "__main__":
    key = jax.random.PRNGKey(0)
    # Positive inputs, as log expects in the typical use case of this module.
    x = jax.random.uniform(key, (2, 4, 16, 16), dtype=jnp.float32,
                           minval=0.0, maxval=2.0)
    y = jax.block_until_ready(log_stable(x, eps=1e-8))
    y_ref = jnp.log(x + 1e-8)
    assert y.shape == x.shape and y.dtype == x.dtype
    assert jnp.allclose(y, y_ref, atol=1e-6, rtol=1e-6)

    # Non-multiple-of-128 path (lane-dense bulk + tiny tail kernel).
    x2 = jax.random.uniform(jax.random.PRNGKey(1), (3, 7, 5), dtype=jnp.float32,
                            minval=0.0, maxval=2.0)
    y2 = jax.block_until_ready(log_stable(x2, eps=1e-8))
    assert jnp.allclose(y2, jnp.log(x2 + 1e-8), atol=1e-6, rtol=1e-6)

    # bf16 input: internal f32 math keeps eps effective and improves accuracy.
    x3 = jax.random.uniform(jax.random.PRNGKey(2), (4, 160), dtype=jnp.bfloat16,
                            minval=0.0, maxval=2.0)
    y3 = jax.block_until_ready(log_stable(x3, eps=1e-8))
    y3_ref = jnp.log(x3.astype(jnp.float32) + 1e-8).astype(jnp.bfloat16)
    assert y3.dtype == x3.dtype
    assert jnp.allclose(y3.astype(jnp.float32), y3_ref.astype(jnp.float32),
                        atol=2e-2, rtol=2e-2)

    print("KERNEL_OK")
</pallas_src>

<mosaic_0001>
module attributes {stable_mosaic.version = 11 : i64} {
  func.func @_log_stable_kernel(%arg0: i32, %arg1: memref<1xf32, #tpu.memory_space<smem>>, %arg2: memref<16x128xf32, #tpu.memory_space<vmem>>, %arg3: memref<16x128xf32, #tpu.memory_space<vmem>>) attributes {dimension_semantics = [#tpu.dimension_semantics<parallel>], iteration_bounds = array<i64: 1>, scalar_prefetch = 0 : i64, scratch_operands = 0 : i64, tpu.core_type = #tpu.core_type<tc>, window_params = [{transform_indices = @transform_0, window_bounds = array<i64: 1>}, {transform_indices = @transform_1, window_bounds = array<i64: 16, 128>}, {transform_indices = @transform_2, window_bounds = array<i64: 16, 128>}]} {
    %c0 = arith.constant 0 : index
    %c0_0 = arith.constant 0 : index
    %0 = vector.load %arg2[%c0, %c0_0] : memref<16x128xf32, #tpu.memory_space<vmem>>, vector<16x128xf32>
    %c0_1 = arith.constant 0 : index
    %1 = memref.load %arg1[%c0_1] : memref<1xf32, #tpu.memory_space<smem>>
    %2 = vector.broadcast %1 : f32 to vector<16x128xf32>
    %3 = arith.addf %0, %2 : vector<16x128xf32>
    %4 = math.log %3 : vector<16x128xf32>
    %c0_2 = arith.constant 0 : index
    %c0_3 = arith.constant 0 : index
    %5 = vector.load %arg3[%c0_2, %c0_3] : memref<16x128xf32, #tpu.memory_space<vmem>>, vector<16x128xf32>
    tpu.vector_store %arg3[%c0_2, %c0_3], %4 {strides = array<i32>} : memref<16x128xf32, #tpu.memory_space<vmem>>, vector<16x128xf32>,
    return
  }
  func.func @transform_0(%arg0: i32) -> i32 {
    %c0_i32 = arith.constant 0 : i32
    %c0_i32_0 = arith.constant 0 : i32
    return %c0_i32 : i32
  }
  func.func @transform_1(%arg0: i32) -> (i32, i32) {
    %c0_i32 = arith.constant 0 : i32
    %c0_i32_0 = arith.constant 0 : i32
    return %arg0, %c0_i32 : i32, i32
  }
  func.func @transform_2(%arg0: i32) -> (i32, i32) {
    %c0_i32 = arith.constant 0 : i32
    %c0_i32_0 = arith.constant 0 : i32
    return %arg0, %c0_i32 : i32, i32
  }
}

</mosaic_0001>

<bundles_post_ra>
// kernel: tpu_custom_call.1
= control target key start
LH: loop header
LB: loop body
LE: loop exit
PB: predicated region body
PF: predicated region fallthrough
CT: control target
= control target key end

     0   :  { %8 = vsyncpa [#allocation4], 0  ;;  %s164_s0 = inlined_call_operand.<no memory space> [shape: f32[1], index: 0, kind: input, shape index: {}]   ;;  %s165_s1 = inlined_call_operand.hbm [shape: f32[16,128], index: 1, kind: input, shape index: {}]   ;;  %s166_s2 = inlined_call_operand.hbm [shape: f32[16,128], index: 2, kind: output, shape index: {}]  }
   0x1   :  { %9 = vsyncpa [#allocation5], 0  ;;  %s112_s9 = smov [#allocation3]   ;;  %s64_s13 = scalar_lea.hbm %s165_s1, 256 }
   0x2   :  { %s17_s10 = sshll.u32 %s112_s9, 4  ;;  %p65_p0 = scmp.ne.s32.totalorder %s165_s1, %s64_s13  ;;  %s18_s10 = int_to_ptr.vmem [resolvable:$true] %s17_s10 }
   0x3   :  { %p68_p1 = scmp.lt.u32.totalorder %s64_s13, %s165_s1 }
   0x5   :  { %p70_p2 = pnand %p68_p1, %p65_p0 }
   0x7   :  { %73 = shalt.err (!%p70_p2)
}
   0x8   :  { %s74_s18 = scalar_lea.vmem %s18_s10, 256  ;;  %p79_p4 = scmp.lt.s32.totalorder %s18_s10, %s18_s10 }
   0x9   :  { %p75_p3 = scmp.ne.s32.totalorder %s18_s10, %s74_s18  ;;  %p80_p5 = scmp.lt.s32.totalorder %s74_s18, %s74_s18 }
   0xb   :  { %p81_p6 = por %p80_p5, %p79_p4 }
   0xd   :  { %p82_p7 = pnand %p81_p6, %p75_p3 }
   0xf   :  { %85 = shalt.err (!%p82_p7)
}
  0x10   :  { %s113_s19 = smov 128   ;;  %s114_s20 = smov 8  }
  0x11   :  { %23 = dma.hbm_to_vmem [thread:$0]  %s165_s1, 256, %s18_s10, [#allocation4], %s113_s19, %s113_s19, %s114_s20  }
  0x12   :  { %108 = dma.done.wait [#allocation4], 256  }
  0x13   :  { %109 = vsyncadd [#allocation4], 4294967040  ;;  %v30_v0 = vstv %s164_s0  ;;  %v27_v1 = vld [vmem:[#allocation3] sm:$0xff]  ;;  %v28_v2 = vld [vmem:[#allocation3 + $0x8] sm:$0xff]  ;;  %s115_s25 = smov [#allocation6]  }
  0x14   :  { %v31_v3 = vadd.f32 %v30_v0, %v27_v1  ;;  %v32_v4 = vadd.f32 %v30_v0, %v28_v2  ;;  %s44_s26 = sshll.u32 %s115_s25, 4  ;;  %s45_s26 = int_to_ptr.vmem [resolvable:$true] %s44_s26 }
  0x15   :  { %s86_s1 = scalar_lea.vmem %s45_s26, 256  ;;  %p91_p9 = scmp.lt.s32.totalorder %s45_s26, %s45_s26 }
  0x16   :  { %60 = vlog2.f32 %v31_v3  ;;  %p87_p8 = scmp.ne.s32.totalorder %s45_s26, %s86_s1  ;;  %p92_p10 = scmp.lt.s32.totalorder %s86_s1, %s86_s1 }
  0x17   :  { %62 = vlog2.f32 %v32_v4 }
  0x18   :  { %p93_p11 = por %p92_p10, %p91_p9 }
  0x1a   :  { %p94_p12 = pnand %p93_p11, %p87_p8 }
  0x20   :  { %v61_v5 = vpop.eup %60 }
  0x21   :  { %v63_v6 = vpop.eup %62  ;;  %v34_v7 = vmul.f32 0.6931472, %v61_v5 }
  0x22   :  { %v36_v8 = vmul.f32 0.6931472, %v63_v6 }
  0x23   :  { %37 = vst [vmem:[#allocation6] sm:$0xff] %v34_v7 }
  0x24   :  { %38 = vst [vmem:[#allocation6 + $0x8] sm:$0xff] %v36_v8 }
  0x25   :  { %97 = shalt.err (!%p94_p12)
}
  0x26   :  { %s98_s28 = scalar_lea.hbm %s166_s2, 256 }
  0x27   :  { %p99_p13 = scmp.ne.s32.totalorder %s166_s2, %s98_s28  ;;  %p102_p0 = scmp.lt.u32.totalorder %s98_s28, %s166_s2 }
  0x29   :  { %p104_p1 = pnand %p102_p0, %p99_p13 }
  0x2b   :  { %107 = shalt.err (!%p104_p1)
}
  0x2c   :  { %50 = dma.vmem_to_hbm [thread:$0]  %s45_s26, 256, %s166_s2, [#allocation5], %s113_s19, %s113_s19, %s114_s20  }
  0x2d   :  { %110 = dma.done.wait [#allocation5], 256  }
  0x2e   :  { %111 = vsyncadd [#allocation5], 4294967040 }
  0x2f   :  { %54 = vsyncpa [#allocation4], 1 }
  0x30   :  { %55 = vsyncpa [#allocation5], 1 }

</bundles_post_ra>
